<compile_context>
chip_gen: v7x
topology: tpu7x:2x2x1
jax: 0.10.0
libtpu: 0.0.40
codegen_flags: <defaults>
</compile_context>

<pallas_src>
import math

import jax
import jax.numpy as jnp
from jax.experimental import pallas as pl
from jax.experimental.pallas import tpu as pltpu


def eca_kernel_size(in_channel, gamma=2, b=1):
    # Matches the PyTorch module: k = |log_{2+b}(C) / gamma|, made odd.
    k = int(abs(math.log(in_channel, 2 + b) / gamma))
    return k if k % 2 else k + 1


def _tpu_vmem_and_cores():
    """Return (per-core VMEM bytes, #TensorCores) with a conservative fallback."""
    try:
        cap = int(pltpu.get_tpu_info().vmem_capacity_bytes)
        cap = max(32 << 20, min(cap, 128 << 20))
    except Exception:
        cap = 64 << 20                      # conservative: v7x per-TC VMEM
    # Heuristic: 64 MiB/TC parts (v7x) have 2 TensorCores; 128 MiB parts have 1.
    num_tc = 2 if cap <= (64 << 20) else 1
    return cap, num_tc


def _channel_conv_sigmoid(pooled, w_ref, kernel_size):
    """K-tap 'same' zero-padded conv along the channel (sublane) axis + sigmoid.

    pooled: (bb, C, 1) f32.  w_ref: (K,) f32 in SMEM.
    """
    # TODO(synk): on v7x with very large bb*C and tiny H*W, relayout pooled so C
    # sits on lanes (lane-dense conv/sigmoid) before the K-tap shifts.
    pad = kernel_size // 2
    C = pooled.shape[1]
    if pad > 0:
        z = jnp.zeros((pooled.shape[0], pad, 1), jnp.float32)
        padded = jnp.concatenate([z, pooled, z], axis=1)   # (bb, C + 2*pad, 1)
    else:
        padded = pooled
    conv = jnp.zeros_like(pooled)
    for k in range(kernel_size):                           # K is tiny & static
        conv = conv + w_ref[k] * jax.lax.slice_in_dim(padded, k, k + C, axis=1)
    return jax.nn.sigmoid(conv)                            # (bb, C, 1) f32 (EUP)


def _make_fused_kernel(kernel_size, inv_hw):
    def kernel(x_ref, w_ref, o_ref):
        # x_ref: (bb, C, HW) VMEM tile; w_ref: (K,) f32 SMEM; o_ref like x_ref.
        x = x_ref[...]
        # Mean over the spatial lane axis in f32 (Mosaic masks the ragged tail).
        # Note for bf16 inputs: verify the widen fuses into the reduce and does
        # not materialize a full f32 tile copy (see performance review).
        pooled = jnp.sum(x.astype(jnp.float32), axis=-1, keepdims=True) * inv_hw
        attn = _channel_conv_sigmoid(pooled, w_ref, kernel_size)
        o_ref[...] = x * attn.astype(x.dtype)              # lane-broadcast multiply
    return kernel


def _make_pool_kernel(kernel_size, inv_hw, hw, hw_chunk):
    def kernel(x_ref, w_ref, attn_ref, acc_ref):
        j = pl.program_id(1)

        @pl.when(j == 0)
        def _():
            acc_ref[...] = jnp.zeros_like(acc_ref)

        x = x_ref[...]                                     # (1, C, hw_chunk)
        # Mask the ragged tail of the last spatial chunk (OOB lanes are undefined).
        offs = jax.lax.broadcasted_iota(jnp.int32, x.shape, 2) + j * hw_chunk
        xm = jnp.where(offs < hw, x.astype(jnp.float32), 0.0)
        acc_ref[...] += jnp.sum(xm, axis=-1, keepdims=True)

        @pl.when(j == pl.num_programs(1) - 1)
        def _():
            attn_ref[...] = _channel_conv_sigmoid(
                acc_ref[...] * inv_hw, w_ref, kernel_size)
    return kernel


def _scale_kernel(x_ref, attn_ref, o_ref):
    o_ref[...] = x_ref[...] * attn_ref[...].astype(x_ref.dtype)


def eca_forward(x, conv_weight, gamma=2, b=1, *, in_place=False,
                force_spatial_split=False, max_hw_chunk=None):
    """x: (B, C, H, W); conv_weight: Conv1d(1,1,K,bias=False) weight, (K,) or (1,1,K)."""
    B, C, H, W = x.shape
    K = eca_kernel_size(C, gamma, b)
    w = jnp.asarray(conv_weight, jnp.float32).reshape(-1)  # accept (K,) or (1,1,K)
    assert w.shape == (K,), f"expected {K} conv taps, got {w.shape}"

    HW = H * W
    itemsize = jnp.dtype(x.dtype).itemsize
    x_flat = x.reshape(B, C, HW)                           # no HBM pad/slice round trip

    vmem_cap, num_tc = _tpu_vmem_and_cores()
    budget = int(vmem_cap * 0.55)                          # double-buffered in+out (4x step)
    target_step = (10 << 20) if vmem_cap <= (64 << 20) else (16 << 20)
    per_batch = C * HW * itemsize
    inv_hw = 1.0 / HW
    # in_place aliases x_flat -> out (safe: each out block depends only on its own
    # input block).  Only profitable when the caller can donate x's buffer.
    io_alias = {0: 0} if in_place else {}

    if (4 * per_batch <= budget) and not force_spatial_split:
        # ---------------- single-pass path: one read + one write of x ----------------
        bb = max(1, min(B,
                        max(1, target_step // per_batch),
                        max(1, budget // (4 * per_batch))))
        if num_tc >= 2 and B >= 2:
            steps = pl.cdiv(B, bb)
            if steps % 2:                                  # balance the two TensorCores
                bb = max(1, pl.cdiv(B, steps + 1))
        grid = (pl.cdiv(B, bb),)                           # partial last block is safe
        step_bytes = 4 * bb * per_batch
        vmem_limit = int(min(max(step_bytes + (4 << 20), 32 << 20),
                             int(vmem_cap * 0.9)))

        out_flat = pl.pallas_call(
            _make_fused_kernel(K, inv_hw),
            out_shape=jax.ShapeDtypeStruct((B, C, HW), x.dtype),
            grid_spec=pltpu.PrefetchScalarGridSpec(
                num_scalar_prefetch=0,
                grid=grid,
                in_specs=[
                    pl.BlockSpec((bb, C, HW), lambda i: (i, 0, 0)),
                    pl.BlockSpec(memory_space=pltpu.MemorySpace.SMEM),   # K raw weights
                ],
                out_specs=pl.BlockSpec((bb, C, HW), lambda i: (i, 0, 0)),
            ),
            input_output_aliases=io_alias,
            compiler_params=pltpu.CompilerParams(
                dimension_semantics=("parallel",),
                vmem_limit_bytes=vmem_limit,
            ),
        )(x_flat, w)
    else:
        # -------- spatial-split fallback: pool pass + scale pass over HW chunks ------
        hw_lanes = pl.cdiv(HW, 128) * 128
        hw_chunk = (budget // (4 * C * itemsize)) // 128 * 128
        hw_chunk = max(128, min(hw_chunk, hw_lanes))
        if max_hw_chunk is not None:
            hw_chunk = max(128, min(hw_chunk, (max_hw_chunk // 128) * 128))
        n_hw = pl.cdiv(HW, hw_chunk)
        step_bytes = 4 * C * hw_chunk * itemsize
        vmem_limit = int(min(max(step_bytes + (4 << 20), 32 << 20),
                             int(vmem_cap * 0.9)))

        attn = pl.pallas_call(
            _make_pool_kernel(K, inv_hw, HW, hw_chunk),
            out_shape=jax.ShapeDtypeStruct((B, C, 1), jnp.float32),
            grid_spec=pltpu.PrefetchScalarGridSpec(
                num_scalar_prefetch=0,
                grid=(B, n_hw),
                in_specs=[
                    pl.BlockSpec((1, C, hw_chunk), lambda i, j: (i, 0, j)),
                    pl.BlockSpec(memory_space=pltpu.MemorySpace.SMEM),
                ],
                out_specs=pl.BlockSpec((1, C, 1), lambda i, j: (i, 0, 0)),
                scratch_shapes=[pltpu.VMEM((1, C, 1), jnp.float32)],
            ),
            compiler_params=pltpu.CompilerParams(
                dimension_semantics=("parallel", "arbitrary"),
                vmem_limit_bytes=vmem_limit,
            ),
        )(x_flat, w)

        out_flat = pl.pallas_call(
            _scale_kernel,
            out_shape=jax.ShapeDtypeStruct((B, C, HW), x.dtype),
            grid_spec=pltpu.PrefetchScalarGridSpec(
                num_scalar_prefetch=0,
                grid=(B, n_hw),
                in_specs=[
                    pl.BlockSpec((1, C, hw_chunk), lambda i, j: (i, 0, j)),
                    pl.BlockSpec((1, C, 1), lambda i, j: (i, 0, 0)),
                ],
                out_specs=pl.BlockSpec((1, C, hw_chunk), lambda i, j: (i, 0, j)),
            ),
            input_output_aliases=io_alias,
            compiler_params=pltpu.CompilerParams(
                dimension_semantics=("parallel", "parallel"),
                vmem_limit_bytes=vmem_limit,
            ),
        )(x_flat, attn)

    return out_flat.reshape(B, C, H, W)


def eca_reference(x, conv_weight, gamma=2, b=1):
    """Pure-JAX reference mirroring the PyTorch forward."""
    B, C, H, W = x.shape
    K = eca_kernel_size(C, gamma, b)
    pad = K // 2
    w = jnp.asarray(conv_weight, jnp.float32).reshape(-1)
    pooled = jnp.mean(x.astype(jnp.float32), axis=(2, 3))          # (B, C)
    padded = jnp.pad(pooled, ((0, 0), (pad, pad)))
    conv = jnp.zeros_like(pooled)
    for k in range(K):
        conv = conv + w[k] * padded[:, k:k + C]
    attn = jax.nn.sigmoid(conv)[:, :, None, None]
    return (attn.astype(x.dtype) * x)


if __name__ == "__main__":
    key = jax.random.PRNGKey(0)

    def run_case(B, C, H, W, **kw):
        K = eca_kernel_size(C)
        kx, kw_ = jax.random.split(jax.random.fold_in(key, B * 1000003 + C * H * W))
        x = jax.random.normal(kx, (B, C, H, W), dtype=jnp.float32)
        bound = 1.0 / math.sqrt(K)
        conv_weight = jax.random.uniform(kw_, (K,), minval=-bound, maxval=bound,
                                         dtype=jnp.float32)
        out = jax.block_until_ready(eca_forward(x, conv_weight, **kw))
        ref = eca_reference(x, conv_weight)
        assert out.shape == (B, C, H, W)
        assert jnp.allclose(out, ref, atol=1e-5, rtol=1e-5), \
            f"mismatch vs reference for case {(B, C, H, W, kw)}"

    # Fused single-pass path.  C=128 -> kernel_size=3.  16x16 is lane-aligned;
    # 15x15 exercises the ragged-tail (HW % 128 != 0) path with no pad/slice.
    run_case(2, 128, 16, 16)
    run_case(2, 128, 15, 15)
    # Spatial-split fallback (pool pass + scale pass), forced at a small shape
    # with a 128-lane chunk so the multi-chunk accumulator path is exercised.
    run_case(2, 128, 15, 15, force_spatial_split=True, max_hw_chunk=128)

    print("KERNEL_OK")
</pallas_src>

<mosaic_0001>
module attributes {stable_mosaic.version = 11 : i64} {
  func.func @kernel(%arg0: i32, %arg1: memref<1x128x256xf32, #tpu.memory_space<vmem>>, %arg2: memref<3xf32, #tpu.memory_space<smem>>, %arg3: memref<1x128x256xf32, #tpu.memory_space<vmem>>) attributes {dimension_semantics = [#tpu.dimension_semantics<parallel>], iteration_bounds = array<i64: 2>, scalar_prefetch = 0 : i64, scratch_operands = 0 : i64, tpu.core_type = #tpu.core_type<tc>, window_params = [{transform_indices = @transform_0, window_bounds = array<i64: 1, 128, 256>}, {transform_indices = @transform_1, window_bounds = array<i64: 3>}, {transform_indices = @transform_2, window_bounds = array<i64: 1, 128, 256>}]} {
    %c0 = arith.constant 0 : index
    %c0_0 = arith.constant 0 : index
    %c0_1 = arith.constant 0 : index
    %0 = vector.load %arg1[%c0, %c0_0, %c0_1] : memref<1x128x256xf32, #tpu.memory_space<vmem>>, vector<1x128x256xf32>
    %cst = arith.constant dense<0.000000e+00> : vector<1x128xf32>
    %1 = vector.multi_reduction <add>, %0, %cst [2] : vector<1x128x256xf32> to vector<1x128xf32>
    %2 = vector.shape_cast %1 : vector<1x128xf32> to vector<1x128x1xf32>
    %cst_2 = arith.constant 3.906250e-03 : f32
    %3 = vector.broadcast %cst_2 : f32 to vector<1x128x1xf32>
    %4 = arith.mulf %2, %3 : vector<1x128x1xf32>
    %cst_3 = arith.constant 0.000000e+00 : f32
    %5 = vector.broadcast %cst_3 : f32 to vector<1x1x1xf32>
    %6 = tpu.concatenate %5, %4, %5 in 1 : vector<1x1x1xf32>, vector<1x128x1xf32>, vector<1x1x1xf32> -> vector<1x130x1xf32>
    %cst_4 = arith.constant 0.000000e+00 : f32
    %7 = vector.broadcast %cst_4 : f32 to vector<1x128x1xf32>
    %c0_5 = arith.constant 0 : index
    %8 = memref.load %arg2[%c0_5] : memref<3xf32, #tpu.memory_space<smem>>
    %9 = vector.extract_strided_slice %6 {offsets = [0, 0, 0], sizes = [1, 128, 1], strides = [1, 1, 1]} : vector<1x130x1xf32> to vector<1x128x1xf32>
    %10 = vector.broadcast %8 : f32 to vector<1x128x1xf32>
    %11 = arith.mulf %10, %9 : vector<1x128x1xf32>
    %12 = arith.addf %7, %11 : vector<1x128x1xf32>
    %c1 = arith.constant 1 : index
    %13 = memref.load %arg2[%c1] : memref<3xf32, #tpu.memory_space<smem>>
    %14 = vector.extract_strided_slice %6 {offsets = [0, 1, 0], sizes = [1, 128, 1], strides = [1, 1, 1]} : vector<1x130x1xf32> to vector<1x128x1xf32>
    %15 = vector.broadcast %13 : f32 to vector<1x128x1xf32>
    %16 = arith.mulf %15, %14 : vector<1x128x1xf32>
    %17 = arith.addf %12, %16 : vector<1x128x1xf32>
    %c2 = arith.constant 2 : index
    %18 = memref.load %arg2[%c2] : memref<3xf32, #tpu.memory_space<smem>>
    %19 = vector.extract_strided_slice %6 {offsets = [0, 2, 0], sizes = [1, 128, 1], strides = [1, 1, 1]} : vector<1x130x1xf32> to vector<1x128x1xf32>
    %20 = vector.broadcast %18 : f32 to vector<1x128x1xf32>
    %21 = arith.mulf %20, %19 : vector<1x128x1xf32>
    %22 = arith.addf %17, %21 : vector<1x128x1xf32>
    %23 = arith.negf %22 : vector<1x128x1xf32>
    %24 = math.exp %23 : vector<1x128x1xf32>
    %cst_6 = arith.constant 1.000000e+00 : f32
    %25 = vector.broadcast %cst_6 : f32 to vector<1x128x1xf32>
    %26 = arith.addf %25, %24 : vector<1x128x1xf32>
    %27 = arith.divf %25, %26 : vector<1x128x1xf32>
    %28 = vector.broadcast %27 : vector<1x128x1xf32> to vector<1x128x256xf32>
    %29 = arith.mulf %0, %28 : vector<1x128x256xf32>
    %c0_7 = arith.constant 0 : index
    %c0_8 = arith.constant 0 : index
    %c0_9 = arith.constant 0 : index
    %30 = vector.load %arg3[%c0_7, %c0_8, %c0_9] : memref<1x128x256xf32, #tpu.memory_space<vmem>>, vector<1x128x256xf32>
    tpu.vector_store %arg3[%c0_7, %c0_8, %c0_9], %29 {strides = array<i32>} : memref<1x128x256xf32, #tpu.memory_space<vmem>>, vector<1x128x256xf32>,
    return
  }
  func.func @transform_0(%arg0: i32) -> (i32, i32, i32) {
    %c0_i32 = arith.constant 0 : i32
    %c0_i32_0 = arith.constant 0 : i32
    %c0_i32_1 = arith.constant 0 : i32
    return %arg0, %c0_i32, %c0_i32_0 : i32, i32, i32
  }
  func.func @transform_1(%arg0: i32) -> i32 {
    %c0_i32 = arith.constant 0 : i32
    %c0_i32_0 = arith.constant 0 : i32
    return %c0_i32 : i32
  }
  func.func @transform_2(%arg0: i32) -> (i32, i32, i32) {
    %c0_i32 = arith.constant 0 : i32
    %c0_i32_0 = arith.constant 0 : i32
    %c0_i32_1 = arith.constant 0 : i32
    return %arg0, %c0_i32, %c0_i32_0 : i32, i32, i32
  }
}

</mosaic_0001>

<bundles_post_ra>
// kernel: tpu_custom_call.1
= control target key start
LH: loop header
LB: loop body
LE: loop exit
PB: predicated region body
PF: predicated region fallthrough
CT: control target
= control target key end

     0   :  { %7 = vsyncpa [#allocation3], 0  ;;  %s1730_s0 = inlined_call_operand.hbm [shape: f32[2,128,256], index: 0, kind: input, shape index: {}]   ;;  %s1731_s1 = inlined_call_operand.vmem [shape: f32[3], index: 1, kind: input, shape index: {}]   ;;  %s1732_s2 = inlined_call_operand.hbm [shape: f32[2,128,256], index: 2, kind: output, shape index: {}]  }
   0x1   :  { %9 = vsyncpa [#allocation3 + $0x1], 0 }
   0x2   :  { %10 = vsyncpa [#allocation5], 0 }
   0x3   :  { %11 = vsyncpa [#allocation4], 0 }
   0x4   :  { %13 = vsyncpa [#allocation4 + $0x1], 0  ;;  %s1220_s9 = smov 0   ;;  %s1222_s10 = smov 0  }
   0x5   :  { %s1224_s11 = smov 0   ;;  %s1226_s12 = smov 0  }
   0x6 LB: > { %s1241_s13 = sadd.s32 4294967295, %s1195_s12   ;;  %s916_s14 = sadd.s32 4294967294, %s1195_s12   ;;  %s1195_s12 = sphi %s1226_s12, %s1758_s12   ;;  %s1191_s11 = sphi %s1224_s11, %s1757_s11   ;;  %s1187_s10 = sphi %s1222_s10, %s1756_s10   ;;  %s1183_s9 = sphi %s1220_s9, %s1755_s9  }
   0x7   : > { %s1245_s15 = sadd.s32 1, %s1195_s12   ;;  %s26_s16 = sadd.s32 1, %s1191_s11 }
   0x8   : > { %s23_s17 = ssub.s32 %s1195_s12, %s1245_s15  ;;  %p33_p0 = scmp.ne.s32.totalorder %s1191_s11, %s1187_s10 }
   0x9   : > { %p24_p1 = scmp.eq.s32.totalorder %s23_s17, 0  ;;  %p34_p2 = scmp.eq.s32.totalorder %s1195_s12, 0 }
   0xa   : > { %p39_p3 = scmp.ne.s32.totalorder %s1187_s10, %s1183_s9  ;;  %p1734_p4 = scmp.eq.s32.totalorder %s1241_s13, 0 }
   0xb   : > { %s1257_s18 = scalar_select %p24_p1, %s1191_s11, %s26_s16  }
   0xc   : > { %p1259_p5 = por %p34_p2, %p33_p0  ;;  %p1265_p6 = por %p1734_p4, %p39_p3 }
   0xd   : > { %p84_p7 = scmp.eq.s32.totalorder %s1241_s13, 1  ;;  %p90_p8 = scmp.eq.s32.totalorder %s916_s14, 1 }
   0xe   : > { %s1739_s20 = scalar_select %p1265_p6, 1, 0 }
   0xf   : > { %p917_p9 = scmp.ge.s32.totalorder %s1195_s12, 1  ;;  %p97_p10 = scmp.lt.s32.totalorder %s1195_s12, 3 }
  0x10   : > { %p1272_p11 = por %p84_p7, %p33_p0  ;;  %p1276_p12 = por %p90_p8, %p39_p3 }
  0x11   : > { %p1280_p13 = pnand %p917_p9, %p97_p10  ;;  %s110_s26 = sshll.u32 %s1731_s1, 4  ;;  %s111_s26 = int_to_ptr.vmem [resolvable:$true] %s110_s26 }
  0x12   : > { %s1740_s21 = scalar_select %p1272_p11, 1, 0 }
  0x13   : > { %s1741_s22 = scalar_select %p1276_p12, 1, 0 }
  0x14   : > { %p960_p1 = pneg %p1280_p13  ;;  %p973_p2 = scmp.lt.s32.totalorder %s1195_s12, 2 }
  0x15   : > { %s121_s28 = sand.u32 1, %s1191_s11   ;;  %s1080_s3 = scalar_lea.vmem %s111_s26, 16 }
  0x16   : > { %p1293_p7 = pnand %p960_p1, %p1734_p4  ;;  %p1300_p3 = pnand %p973_p2, %p1259_p5 }
  0x17   : > { %s920_s30 = sshll.u32 %s121_s28, 8  ;;  %p1081_p8 = scmp.ne.s32.totalorder %s111_s26, %s1080_s3 }
  0x18   : > { %p1082_p9 = pneg %p1293_p7  ;;  %p1088_p12 = scmp.lt.s32.totalorder %s111_s26, %s111_s26 }
  0x19   : > { %p1089_p11 = scmp.lt.s32.totalorder %s1080_s3, %s1080_s3 }
  0x1a   : > { %p1083_p10 = pnand %p1082_p9, %p1081_p8 }
  0x1b   : > { %p1090_p1 = por %p1089_p11, %p1088_p12 }
  0x1c   : > { %p1084_p0 = pneg %p1083_p10 }
  0x1e   : > { %p1091_p4 = pnand %p1090_p1, %p1084_p0 }
  0x20   : > { %1094 = shalt.err (!%p1091_p4)
}
  0x21   : > { %s1197_s4 = smov [#allocation6]   ;;  %s950_s5 = sshll.u32 %s1195_s12, 12 }
  0x22   : > { %963 = dma.vmem_to_smem (!%p1293_p7), %s111_s26, 16, %s1197_s4, [#allocation5]  }
  0x23   : > { %s125_s6 = scalar_lea.vmem [#allocation2], %s920_s30  ;;  %s1312_s16 = scalar_lea.hbm %s1730_s0, %s950_s5 }
  0x24   : > { %s132_s7 = sshll.u32 %s125_s6, 4  ;;  %s1316_s17 = scalar_lea.sflag [#allocation3], %s121_s28  ;;  %s1314_s7 = int_to_ptr.vmem [resolvable:$true] %s132_s7 }
  0x25   : > { %s1095_s19 = scalar_lea.hbm %s1312_s16, 4096  ;;  %p1097_p5 = pneg %p1300_p3 }
  0x26   : > { %p1096_p4 = scmp.ne.s32.totalorder %s1312_s16, %s1095_s19  ;;  %s1100_s26 = scalar_lea.hbm %s1730_s0, 8192 }
  0x27   : > { %p1101_p0 = scmp.lt.u32.totalorder %s1312_s16, %s1730_s0  ;;  %p1102_p2 = scmp.lt.u32.totalorder %s1100_s26, %s1095_s19 }
  0x28   : > { %p1098_p11 = pnand %p1097_p5, %p1096_p4  ;;  %p1104_p8 = scmp.lt.u32.totalorder %s1095_s19, %s1312_s16 }
  0x29   : > { %p1103_p7 = por %p1102_p2, %p1101_p0 }
  0x2a   : > { %p1099_p12 = pneg %p1098_p11 }
  0x2b   : > { %p1105_p9 = por %p1104_p8, %p1103_p7 }
  0x2d   : > { %p1106_p10 = pnand %p1105_p9, %p1099_p12 }
  0x2f   : > { %1109 = shalt.err (!%p1106_p10)
}
  0x30   : > { %s1110_s28 = scalar_lea.vmem %s1314_s7, 4096  ;;  %s1198_s3 = smov [#allocation2]  }
  0x31   : > { %p1111_p1 = scmp.ne.s32.totalorder %s1314_s7, %s1110_s28  ;;  %s1115_s4 = sshll.u32 %s1198_s3, 4  ;;  %s1116_s4 = int_to_ptr.vmem [resolvable:$false] %s1115_s4 }
  0x32   : > { %s1117_s5 = scalar_lea.vmem %s1116_s4, 8192  ;;  %p1118_p6 = scmp.lt.s32.totalorder %s1314_s7, %s1116_s4 }
  0x33   : > { %p1113_p4 = pnand %p1111_p1, %p1097_p5  ;;  %p1119_p0 = scmp.lt.s32.totalorder %s1117_s5, %s1110_s28 }
  0x35   : > { %p1114_p11 = pneg %p1113_p4  ;;  %p1120_p2 = por %p1119_p0, %p1118_p6 }
  0x37   : > { %p1121_p7 = pnand %p1120_p2, %p1114_p11 }
  0x39   : > { %1124 = shalt.err (!%p1121_p7)
}
  0x3a   : > { %s1199_s6 = smov 256   ;;  %s1200_s8 = smov 16  }
  0x3b   : > { %967 = dma.hbm_to_vmem [thread:$0]  (!%p1300_p3), %s1312_s16, 4096, %s1314_s7, %s1316_s17, %s1199_s6, %s1199_s6, %s1200_s8  }
  0x3c   : > { %144 = sbr.rel (%p1280_p13) target bundleno = 464 (0x1d0), region = 28 }
  0x43   : > { %s1347_s14 = sand.u32 1, %s1187_s10   ;;  %p1745_p6 = scmp.ne.s32.totalorder %s1739_s20, 0 }
  0x44   : > { %s924_s19 = sshll.u32 %s1347_s14, 8  ;;  %s147_s24 = scalar_lea.sflag [#allocation3], %s1347_s14 }
  0x45   : > { %s1353_s25 = scalar_lea.vmem [#allocation2], %s924_s19 }
  0x46   : > { %1170 = dma.done.wait (%p1745_p6), %s147_s24, 4096  }
  0x47   : > { %1172 = vsyncadd (%p1745_p6), %s147_s24, 4294963200  ;;  %p1746_p3 = scmp.eq.s32.totalorder %s1241_s13, 0 }
  0x49   : > { %1174 = dma.done.wait (%p1746_p3), [#allocation5], 16   ;;  %p1747_p13 = pmov %p1746_p3 }
  0x4b   : > { %1176 = vsyncadd (%p1747_p13), [#allocation5], 4294967280 }
  0x4c   : > { %159 = sfence }
  0x4d   : > { %v1364_v0 = vld [vmem:[%s1353_s25 + $0x20] sm:$0xff]  ;;  %v1367_v1 = vld [vmem:[%s1353_s25 + $0x28] sm:$0xff]  ;;  %v1378_v5 = vld [vmem:[%s1353_s25 + $0x30] sm:$0xff]  ;;  %v1201_v48 = vmov 0   ;;  %s927_s20 = sld [smem:[#allocation6 + $0x1]]  ;;  %s928_s23 = sld [smem:[#allocation6 + $0x2]] }
  0x4e   : > { %v1370_v2 = vld [vmem:[%s1353_s25] sm:$0xff]  ;;  %v214_v3 = vadd.f32 %v1367_v1, %v1364_v0  ;;  %v1375_v4 = vld [vmem:[%s1353_s25 + $0x8] sm:$0xff]  ;;  %v1381_v6 = vld [vmem:[%s1353_s25 + $0x38] sm:$0xff]  ;;  %1015 = vset.pattern.permute.xlu1 %v1201_v48  ;;  %1014 = vset.pattern.permute.xlu0 %v1201_v48  ;;  %s339_s29 = sld [smem:[#allocation6]]  ;;  %vm288_vm0 = vcmask 1040384   ;;  %vm409_vm1 = vcmask 1046528  }
  0x4f   : > { %v208_v7 = vadd.f32 %v1375_v4, %v1370_v2  ;;  %v1386_v8 = vld [vmem:[%s1353_s25 + $0x10] sm:$0xff]  ;;  %v1389_v9 = vld [vmem:[%s1353_s25 + $0x18] sm:$0xff]  ;;  %v217_v10 = vadd.f32 %v1381_v6, %v1378_v5  ;;  %v1402_v14 = vld [vmem:[%s1353_s25 + $0x40] sm:$0xff]  ;;  %vm511_vm2 = vcmask 1045504   ;;  %s1617_s7 = scalar_lea.vmem [#allocation7], %s924_s19  ;;  %s951_s16 = sshll.u32 %s1241_s13, 12 }
  0x50   : > { %215 = vadd.xlane.f32.xlu1 %v214_v3  ;;  %v211_v11 = vadd.f32 %v1389_v9, %v1386_v8  ;;  %v1396_v12 = vld [vmem:[%s1353_s25 + $0x50] sm:$0xff]  ;;  %v1399_v13 = vld [vmem:[%s1353_s25 + $0x58] sm:$0xff]  ;;  %v1405_v15 = vld [vmem:[%s1353_s25 + $0x48] sm:$0xff]  ;;  %s831_s17 = sshll.u32 %s1617_s7, 4  ;;  %s1678_s30 = scalar_lea.hbm %s1732_s2, %s951_s16  ;;  %s1680_s17 = int_to_ptr.vmem [resolvable:$true] %s831_s17 }
  0x51   : > { %209 = vadd.xlane.f32.xlu0 %v208_v7  ;;  %v223_v16 = vadd.f32 %v1399_v13, %v1396_v12  ;;  %v220_v17 = vadd.f32 %v1405_v15, %v1402_v14  ;;  %v1412_v18 = vld [vmem:[%s1353_s25 + $0x70] sm:$0xff]  ;;  %v1415_v19 = vld [vmem:[%s1353_s25 + $0x78] sm:$0xff]  ;;  %v1418_v20 = vld [vmem:[%s1353_s25 + $0x60] sm:$0xff]  ;;  %s818_s13 = scalar_lea.sflag [#allocation4], %s1347_s14  ;;  %s1125_s28 = scalar_lea.vmem %s1680_s17, 4096 }
  0x52   : > { %v1421_v21 = vld [vmem:[%s1353_s25 + $0x68] sm:$0xff]  ;;  %v229_v22 = vadd.f32 %v1415_v19, %v1412_v18  ;;  %v1428_v24 = vld [vmem:[%s1353_s25 + $0x90] sm:$0xff]  ;;  %v1431_v25 = vld [vmem:[%s1353_s25 + $0x98] sm:$0xff]  ;;  %p1126_p5 = scmp.ne.s32.totalorder %s1680_s17, %s1125_s28  ;;  %p1752_p12 = scmp.ne.s32.totalorder %s1740_s21, 0 }
  0x53   : > { %v226_v23 = vadd.f32 %v1421_v21, %v1418_v20  ;;  %v1434_v26 = vld [vmem:[%s1353_s25 + $0x80] sm:$0xff]  ;;  %v1437_v27 = vld [vmem:[%s1353_s25 + $0x88] sm:$0xff]  ;;  %v235_v28 = vadd.f32 %v1431_v25, %v1428_v24  ;;  %v1444_v30 = vld [vmem:[%s1353_s25 + $0xb0] sm:$0xff]  ;;  %v1491_v53 = vstv %s927_s20  ;;  %s1202_s3 = smov [#allocation7]  }
  0x54   : > { %218 = vadd.xlane.f32.xlu1 %v217_v10  ;;  %v232_v29 = vadd.f32 %v1437_v27, %v1434_v26  ;;  %v1447_v31 = vld [vmem:[%s1353_s25 + $0xb8] sm:$0xff]  ;;  %v1450_v32 = vld [vmem:[%s1353_s25 + $0xa0] sm:$0xff]  ;;  %v1453_v33 = vld [vmem:[%s1353_s25 + $0xa8] sm:$0xff]  ;;  %v1493_v54 = vstv %s928_s23  ;;  %p1127_p8 = pnand %p1126_p5, %p1752_p12  ;;  %s1129_s4 = sshll.u32 %s1202_s3, 4  ;;  %s1130_s4 = int_to_ptr.vmem [resolvable:$false] %s1129_s4 }
  0x55   : > { %212 = vadd.xlane.f32.xlu0 %v211_v11  ;;  %v241_v34 = vadd.f32 %v1447_v31, %v1444_v30  ;;  %v238_v35 = vadd.f32 %v1453_v33, %v1450_v32  ;;  %v1460_v36 = vld [vmem:[%s1353_s25 + $0xd0] sm:$0xff]  ;;  %v1463_v37 = vld [vmem:[%s1353_s25 + $0xd8] sm:$0xff]  ;;  %v1466_v38 = vld [vmem:[%s1353_s25 + $0xc0] sm:$0xff]  ;;  %v1495_v60 = vstv %s339_s29  ;;  %s1131_s5 = scalar_lea.vmem %s1130_s4, 8192  ;;  %p1132_p10 = scmp.lt.s32.totalorder %s1680_s17, %s1130_s4 }
  0x56   : > { %v1469_v39 = vld [vmem:[%s1353_s25 + $0xc8] sm:$0xff]  ;;  %v247_v40 = vadd.f32 %v1463_v37, %v1460_v36  ;;  %v1476_v42 = vld [vmem:[%s1353_s25 + $0xf0] sm:$0xff]  ;;  %v1479_v43 = vld [vmem:[%s1353_s25 + $0xf8] sm:$0xff]  ;;  %p1128_p9 = pneg %p1127_p8  ;;  %p1133_p1 = scmp.lt.s32.totalorder %s1131_s5, %s1125_s28 }
  0x57   : > { %v244_v41 = vadd.f32 %v1469_v39, %v1466_v38  ;;  %1748 = vst [vmem:[#allocation11_spill] sm:$0xff] %v1476_v42  ;;  %1749 = vst [vmem:[#allocation12_spill] sm:$0xff] %v1479_v43  ;;  %v1482_v44 = vld [vmem:[%s1353_s25 + $0xe0] sm:$0xff]  ;;  %v1485_v45 = vld [vmem:[%s1353_s25 + $0xe8] sm:$0xff]  ;;  %v253_v46 = vadd.f32 %v1479_v43, %v1476_v42 }
  0x58   : > { %224 = vadd.xlane.f32.xlu1 %v223_v16  ;;  %v250_v47 = vadd.f32 %v1485_v45, %v1482_v44  ;;  %p1134_p4 = por %p1133_p1, %p1132_p10 }
  0x59   : > { %221 = vadd.xlane.f32.xlu0 %v220_v17 }
  0x5a   : > { %p1135_p11 = pnand %p1134_p4, %p1128_p9 }
  0x5c   : > { %230 = vadd.xlane.f32.xlu1 %v229_v22 }
  0x5d   : > { %227 = vadd.xlane.f32.xlu0 %v226_v23 }
  0x60   : > { %236 = vadd.xlane.f32.xlu1 %v235_v28 }
  0x61   : > { %233 = vadd.xlane.f32.xlu0 %v232_v29 }
  0x64   : > { %242 = vadd.xlane.f32.xlu1 %v241_v34 }
  0x65   : > { %239 = vadd.xlane.f32.xlu0 %v238_v35 }
  0x68   : > { %248 = vadd.xlane.f32.xlu1 %v247_v40 }
  0x69   : > { %245 = vadd.xlane.f32.xlu0 %v244_v41 }
  0x6c   : > { %254 = vadd.xlane.f32.xlu1 %v253_v46 }
  0x6d   : > { %251 = vadd.xlane.f32.xlu0 %v250_v47 }
  0xdd   : > { %v216_v49 = vpop.xlane.xlu1 %215 }
  0xde   : > { %v258_v50 = vmul.f32 0.00390625, %v216_v49  ;;  %v210_v51 = vpop.xlane.xlu0 %209 }
  0xdf   : > { %v256_v52 = vmul.f32 0.00390625, %v210_v51 }
  0xe0   : > { %v292_v57 = vrot.slane %v258_v50, 7 }
  0xe1   : > { %v289_v55 = vrot.slane %v256_v52, 7  ;;  %v219_v56 = vpop.xlane.xlu1 %218 }
  0xe2   : > { %v259_v58 = vmul.f32 0.00390625, %v219_v56  ;;  %v213_v59 = vpop.xlane.xlu0 %212 }
  0xe3   : > { %v337_v61 = vsel %vm288_vm0, 0.0, %v289_v55  ;;  %v257_v62 = vmul.f32 0.00390625, %v213_v59 }
  0xe4   : > { %v375_v63 = vmul.f32 %v1491_v53, %v337_v61  ;;  %v477_v3 = vmul.f32 %v1493_v54, %v337_v61  ;;  %v294_v7 = vrot.slane %v259_v58, 7  ;;  %v341_v16 = vmul.f32 %v1495_v60, %v337_v61 }
  0xe5   : > { %v290_v10 = vrot.slane %v257_v62, 7  ;;  %v225_v11 = vpop.xlane.xlu1 %224 }
  0xe6   : > { %v410_v17 = vrot.slane %v375_v63, 1  ;;  %v295_v22 = vsel %vm288_vm0, %v292_v57, %v294_v7  ;;  %v222_v23 = vpop.xlane.xlu0 %221  ;;  %v261_v35 = vmul.f32 0.00390625, %v225_v11  ;;  %v512_v40 = vrot.slane %v477_v3, 2 }
  0xe7   : > { %v1503_v28 = vmul.f32 %v1491_v53, %v295_v22  ;;  %v1506_v29 = vmul.f32 %v1493_v54, %v295_v22  ;;  %v291_v34 = vsel %vm288_vm0, %v289_v55, %v290_v10  ;;  %v293_v41 = vsel %vm288_vm0, %v290_v10, %v292_v57 }
  0xe8   : > { %v376_v46 = vmul.f32 %v1491_v53, %v291_v34  ;;  %v478_v47 = vmul.f32 %v1493_v54, %v291_v34  ;;  %v344_v48 = vmul.f32 %v1495_v60, %v295_v22  ;;  %v342_v50 = vmul.f32 %v1495_v60, %v291_v34 }
  0xe9   : > { %v415_v49 = vrot.slane %v1503_v28, 1  ;;  %v377_v51 = vmul.f32 %v1491_v53, %v293_v41  ;;  %v517_v52 = vrot.slane %v1506_v29, 2  ;;  %v479_v55 = vmul.f32 %v1493_v54, %v293_v41  ;;  %v231_v43 = vpop.xlane.xlu1 %230 }
  0xea   : > { %v411_v56 = vrot.slane %v376_v46, 1  ;;  %v513_v58 = vrot.slane %v478_v47, 2  ;;  %v228_v59 = vpop.xlane.xlu0 %227  ;;  %v298_v61 = vrot.slane %v261_v35, 7  ;;  %v260_v62 = vmul.f32 0.00390625, %v222_v23 }
  0xeb   : > { %v413_v57 = vrot.slane %v377_v51, 1  ;;  %v262_v63 = vmul.f32 0.00390625, %v228_v59  ;;  %v343_v3 = vmul.f32 %v1495_v60, %v293_v41  ;;  %v515_v22 = vrot.slane %v479_v55, 2 }
  0xec   : > { %v412_v10 = vsel %vm409_vm1, %v410_v17, %v411_v56  ;;  %v514_v11 = vsel %vm511_vm2, %v512_v40, %v513_v58  ;;  %v296_v46 = vrot.slane %v260_v62, 7 }
  0xed   : > { %v414_v28 = vsel %vm409_vm1, %v411_v56, %v413_v57  ;;  %v416_v29 = vsel %vm409_vm1, %v413_v57, %v415_v49  ;;  %v459_v34 = vadd.f32 %v412_v10, %v341_v16  ;;  %v516_v35 = vsel %vm511_vm2, %v513_v58, %v515_v22 }
  0xee   : > { %v460_v47 = vadd.f32 %v414_v28, %v342_v50  ;;  %v461_v42 = vadd.f32 %v416_v29, %v343_v3  ;;  %v518_v23 = vsel %vm511_vm2, %v515_v22, %v517_v52  ;;  %v297_v41 = vsel %vm288_vm0, %v294_v7, %v296_v46  ;;  %v234_v3 = vpop.xlane.xlu0 %233 }
  0xef   : > { %v561_v51 = vadd.f32 %v514_v11, %v459_v34  ;;  %v299_v17 = vsel %vm288_vm0, %v296_v46, %v298_v61  ;;  %v300_v40 = vrot.slane %v262_v63, 7  ;;  %v345_v56 = vmul.f32 %v1495_v60, %v297_v41  ;;  %v237_v46 = vpop.xlane.xlu1 %236 }
  0xf0   : > { %v562_v55 = vadd.f32 %v516_v35, %v460_v47  ;;  %v563_v59 = vadd.f32 %v518_v23, %v461_v42  ;;  %v263_v57 = vmul.f32 0.00390625, %v231_v43  ;;  %v379_v62 = vmul.f32 %v1491_v53, %v297_v41 }
  0xf1   : > { %v929_v16 = vmul.f32 -1.442695, %v561_v51  ;;  %v380_v50 = vmul.f32 %v1491_v53, %v299_v17  ;;  %v481_v58 = vmul.f32 %v1493_v54, %v297_v41  ;;  %v482_v7 = vmul.f32 %v1493_v54, %v299_v17 }
  0xf2   : > { %v930_v10 = vmul.f32 -1.442695, %v562_v55  ;;  %v931_v11 = vmul.f32 -1.442695, %v563_v59  ;;  %v301_v22 = vsel %vm288_vm0, %v298_v61, %v300_v40  ;;  %v417_v63 = vrot.slane %v379_v62, 1 }
  0xf3   : > { %1016 = vpow2.f32 %v929_v16  ;;  %v419_v42 = vrot.slane %v380_v50, 1  ;;  %v519_v28 = vrot.slane %v481_v58, 2  ;;  %v346_v43 = vmul.f32 %v1495_v60, %v299_v17  ;;  %v240_v50 = vpop.xlane.xlu0 %239 }
  0xf4   : > { %1018 = vpow2.f32 %v930_v10  ;;  %v521_v29 = vrot.slane %v482_v7, 2  ;;  %v381_v34 = vmul.f32 %v1491_v53, %v301_v22  ;;  %v418_v47 = vsel %vm409_vm1, %v415_v49, %v417_v63 }
  0xf5   : > { %1020 = vpow2.f32 %v931_v11  ;;  %v420_v35 = vsel %vm409_vm1, %v417_v63, %v419_v42  ;;  %v520_v23 = vsel %vm511_vm2, %v517_v52, %v519_v28  ;;  %v462_v51 = vadd.f32 %v418_v47, %v344_v48 }
  0xf6   : > { %v463_v61 = vadd.f32 %v420_v35, %v345_v56  ;;  %v522_v41 = vsel %vm511_vm2, %v519_v28, %v521_v29  ;;  %v421_v55 = vrot.slane %v381_v34, 1  ;;  %v483_v59 = vmul.f32 %v1493_v54, %v301_v22 }
  0xf7   : > { %v302_v16 = vrot.slane %v263_v57, 7  ;;  %v264_v17 = vmul.f32 0.00390625, %v234_v3  ;;  %v1540_v62 = vmul.f32 0.00390625, %v237_v46  ;;  %v564_v58 = vadd.f32 %v520_v23, %v462_v51 }
  0xf8   : > { %v565_v10 = vadd.f32 %v522_v41, %v463_v61  ;;  %v347_v49 = vmul.f32 %v1495_v60, %v301_v22  ;;  %v422_v11 = vsel %vm409_vm1, %v419_v42, %v421_v55  ;;  %v523_v52 = vrot.slane %v483_v59, 2  ;;  %v243_v41 = vpop.xlane.xlu1 %242 }
  0xf9   : > { %v464_v7 = vadd.f32 %v422_v11, %v346_v43  ;;  %v303_v48 = vsel %vm288_vm0, %v300_v40, %v302_v16  ;;  %v304_v56 = vrot.slane %v264_v17, 7  ;;  %v932_v63 = vmul.f32 -1.442695, %v564_v58 }
  0xfa   : > { %v933_v28 = vmul.f32 -1.442695, %v565_v10  ;;  %v382_v34 = vmul.f32 %v1491_v53, %v303_v48  ;;  %v1546_v57 = vmul.f32 0.00390625, %v240_v50  ;;  %v524_v3 = vsel %vm511_vm2, %v521_v29, %v523_v52 }
  0xfb   : > { %v484_v46 = vmul.f32 %v1493_v54, %v303_v48  ;;  %v305_v47 = vsel %vm288_vm0, %v302_v16, %v304_v56  ;;  %v306_v22 = vrot.slane %v1540_v62, 7  ;;  %1022 = vpow2.f32 %v932_v63 }
  0xfc   : > { %v566_v42 = vadd.f32 %v524_v3, %v464_v7  ;;  %v348_v43 = vmul.f32 %v1495_v60, %v303_v48  ;;  %v423_v40 = vrot.slane %v382_v34, 1  ;;  %1024 = vpow2.f32 %v933_v28 }
  0xfd   : > { %v1017_v35 = vpop.eup %1016  ;;  %v525_v23 = vrot.slane %v484_v46, 2  ;;  %v383_v51 = vmul.f32 %v1491_v53, %v305_v47  ;;  %v485_v61 = vmul.f32 %v1493_v54, %v305_v47  ;;  %v307_v62 = vsel %vm288_vm0, %v304_v56, %v306_v22 }
  0xfe   : > { %v1019_v29 = vpop.eup %1018  ;;  %v625_v59 = vadd.f32 1.0, %v1017_v35  ;;  %v934_v17 = vmul.f32 -1.442695, %v566_v42  ;;  %v424_v16 = vsel %vm409_vm1, %v421_v55, %v423_v40  ;;  %v349_v63 = vmul.f32 %v1495_v60, %v305_v47  ;;  %v246_v55 = vpop.xlane.xlu0 %245 }
  0xff   : > { %v1021_v50 = vpop.eup %1020  ;;  %v626_v58 = vadd.f32 1.0, %v1019_v29  ;;  %v465_v10 = vadd.f32 %v424_v16, %v347_v49  ;;  %v526_v11 = vsel %vm511_vm2, %v523_v52, %v525_v23  ;;  %v425_v7 = vrot.slane %v383_v51, 1  ;;  %v249_v47 = vpop.xlane.xlu1 %248 }
 0x100   : > { %v627_v48 = vadd.f32 1.0, %v1021_v50  ;;  %1026 = vrcp.f32 %v625_v59  ;;  %v527_v28 = vrot.slane %v485_v61, 2  ;;  %v384_v46 = vmul.f32 %v1491_v53, %v307_v62 }
 0x101   : > { %1028 = vrcp.f32 %v626_v58  ;;  %v567_v34 = vadd.f32 %v526_v11, %v465_v10  ;;  %v426_v3 = vsel %vm409_vm1, %v423_v40, %v425_v7  ;;  %v486_v49 = vmul.f32 %v1493_v54, %v307_v62 }
 0x102   : > { %1030 = vrcp.f32 %v627_v48  ;;  %v466_v56 = vadd.f32 %v426_v3, %v348_v43  ;;  %v528_v42 = vsel %vm511_vm2, %v525_v23, %v527_v28  ;;  %v427_v35 = vrot.slane %v384_v46, 1 }
 0x103   : > { %1032 = vpow2.f32 %v934_v17  ;;  %v935_v52 = vmul.f32 -1.442695, %v567_v34  ;;  %v308_v51 = vrot.slane %v1546_v57, 7  ;;  %v529_v29 = vrot.slane %v486_v49, 2 }
 0x104   : > { %v568_v61 = vadd.f32 %v528_v42, %v466_v56  ;;  %v267_v59 = vmul.f32 0.00390625, %v243_v41  ;;  %v268_v16 = vmul.f32 0.00390625, %v246_v55  ;;  %v350_v40 = vmul.f32 %v1495_v60, %v307_v62 }
 0x105   : > { %1034 = vpow2.f32 %v935_v52  ;;  %v428_v50 = vsel %vm409_vm1, %v425_v7, %v427_v35  ;;  %v309_v43 = vsel %vm288_vm0, %v306_v22, %v308_v51  ;;  %v1023_v23 = vpop.eup %1022  ;;  %v530_v17 = vsel %vm511_vm2, %v527_v28, %v529_v29 }
 0x106   : > { %v936_v58 = vmul.f32 -1.442695, %v568_v61  ;;  %v467_v10 = vadd.f32 %v428_v50, %v349_v63  ;;  %v1568_v11 = vmul.f32 0.00390625, %v249_v47  ;;  %v1025_v57 = vpop.eup %1024  ;;  %v628_v48 = vadd.f32 1.0, %v1023_v23  ;;  %v252_v50 = vpop.xlane.xlu0 %251 }
 0x107   : > { %v385_v34 = vmul.f32 %v1491_v53, %v309_v43  ;;  %v487_v41 = vmul.f32 %v1493_v54, %v309_v43  ;;  %v310_v3 = vrot.slane %v267_v59, 7  ;;  %v629_v46 = vadd.f32 1.0, %v1025_v57 }
 0x108   : > { %1036 = vpow2.f32 %v936_v58  ;;  %v569_v62 = vadd.f32 %v530_v17, %v467_v10  ;;  %v312_v7 = vrot.slane %v268_v16, 7  ;;  %v351_v42 = vmul.f32 %v1495_v60, %v309_v43 }
 0x109   : > { %1038 = vrcp.f32 %v628_v48  ;;  %v429_v22 = vrot.slane %v385_v34, 1  ;;  %v531_v55 = vrot.slane %v487_v41, 2  ;;  %v311_v63 = vsel %vm288_vm0, %v308_v51, %v310_v3 }
 0x10a   : > { %v1027_v56 = vpop.eup %1026  ;;  %1040 = vrcp.f32 %v629_v46  ;;  %v937_v28 = vmul.f32 -1.442695, %v569_v62  ;;  %v386_v49 = vmul.f32 %v1491_v53, %v311_v63  ;;  %v488_v59 = vmul.f32 %v1493_v54, %v311_v63 }
 0x10b   : > { %v1029_v52 = vpop.eup %1028  ;;  %v430_v47 = vsel %vm409_vm1, %v427_v35, %v429_v22  ;;  %v532_v61 = vsel %vm511_vm2, %v529_v29, %v531_v55  ;;  %v313_v16 = vsel %vm288_vm0, %v310_v3, %v312_v7  ;;  %675 = vperm.xlu0 %1014, %v1027_v56   ;;  %v352_v58 = vmul.f32 %v1495_v60, %v311_v63 }
 0x10c   : > { %v1031_v23 = vpop.eup %1030  ;;  %1042 = vpow2.f32 %v937_v28  ;;  %v468_v51 = vadd.f32 %v430_v47, %v350_v40  ;;  %v431_v10 = vrot.slane %v386_v49, 1  ;;  %680 = vperm.xlu1 %1015, %v1029_v52   ;;  %v533_v17 = vrot.slane %v488_v59, 2  ;;  %v255_v59 = vpop.xlane.xlu1 %254 }
 0x10d   : > { %v1033_v43 = vpop.eup %1032  ;;  %v387_v57 = vmul.f32 %v1491_v53, %v313_v16  ;;  %v489_v35 = vmul.f32 %v1493_v54, %v313_v16  ;;  %v314_v29 = vrot.slane %v1568_v11, 7  ;;  %v270_v3 = vmul.f32 0.00390625, %v252_v50 }
 0x10e   : > { %v630_v48 = vadd.f32 1.0, %v1033_v43  ;;  %v570_v34 = vadd.f32 %v532_v61, %v468_v51  ;;  %v432_v41 = vsel %vm409_vm1, %v429_v22, %v431_v10  ;;  %v534_v40 = vsel %vm511_vm2, %v531_v55, %v533_v17 }
 0x10f   : > { %v1035_v46 = vpop.eup %1034  ;;  %v469_v62 = vadd.f32 %v432_v41, %v351_v42  ;;  %v433_v63 = vrot.slane %v387_v57, 1  ;;  %v535_v56 = vrot.slane %v489_v35, 2  ;;  %v315_v49 = vsel %vm288_vm0, %v312_v7, %v314_v29 }
 0x110   : > { %1044 = vrcp.f32 %v630_v48  ;;  %v938_v28 = vmul.f32 -1.442695, %v570_v34  ;;  %685 = vperm.xlu1 %1015, %v1031_v23   ;;  %v631_v52 = vadd.f32 1.0, %v1035_v46  ;;  %v388_v42 = vmul.f32 %v1491_v53, %v315_v49 }
 0x111   : > { %v571_v47 = vadd.f32 %v534_v40, %v469_v62  ;;  %v434_v11 = vsel %vm409_vm1, %v431_v10, %v433_v63  ;;  %v536_v61 = vsel %vm511_vm2, %v533_v17, %v535_v56  ;;  %v490_v55 = vmul.f32 %v1493_v54, %v315_v49 }
 0x112   : > { %v1037_v22 = vpop.eup %1036  ;;  %v470_v50 = vadd.f32 %v434_v11, %v352_v58  ;;  %1046 = vpow2.f32 %v938_v28  ;;  %v353_v57 = vmul.f32 %v1495_v60, %v313_v16  ;;  %v316_v7 = vrot.slane %v270_v3, 7 }
 0x113   : > { %v1039_v51 = vpop.eup %1038  ;;  %v939_v43 = vmul.f32 -1.442695, %v571_v47  ;;  %v435_v48 = vrot.slane %v388_v42, 1  ;;  %v537_v34 = vrot.slane %v490_v55, 2  ;;  %v271_v10 = vmul.f32 0.00390625, %v255_v59 }
 0x114   : > { %v1041_v23 = vpop.eup %1040  ;;  %v572_v35 = vadd.f32 %v536_v61, %v470_v50  ;;  %690 = vperm.xlu1 %1015, %v1039_v51   ;;  %1048 = vrcp.f32 %v631_v52  ;;  %v632_v17 = vadd.f32 1.0, %v1037_v22  ;;  %v317_v58 = vsel %vm288_vm0, %v314_v29, %v316_v7 }
 0x115   : > { %1050 = vpow2.f32 %v939_v43  ;;  %v436_v62 = vsel %vm409_vm1, %v433_v63, %v435_v48  ;;  %v538_v40 = vsel %vm511_vm2, %v535_v56, %v537_v34  ;;  %v389_v3 = vmul.f32 %v1491_v53, %v317_v58 }
 0x116   : > { %v1043_v41 = vpop.eup %1042  ;;  %v940_v46 = vmul.f32 -1.442695, %v572_v35  ;;  %v471_v16 = vadd.f32 %v436_v62, %v353_v57  ;;  %v354_v47 = vmul.f32 %v1495_v60, %v315_v49  ;;  %v491_v11 = vmul.f32 %v1493_v54, %v317_v58 }
 0x117   : > { %v633_v28 = vadd.f32 1.0, %v1043_v41  ;;  %v318_v52 = vrot.slane %v271_v10, 7  ;;  %v437_v61 = vrot.slane %v389_v3, 1  ;;  %v355_v22 = vmul.f32 %v1495_v60, %v317_v58 }
 0x118   : > { %1052 = vpow2.f32 %v940_v46  ;;  %695 = vperm.xlu1 %1015, %v1041_v23   ;;  %v573_v29 = vadd.f32 %v538_v40, %v471_v16  ;;  %v539_v63 = vrot.slane %v491_v11, 2 }
 0x119   : > { %1054 = vrcp.f32 %v632_v17  ;;  %v319_v56 = vsel %vm288_vm0, %v316_v7, %v318_v52  ;;  %v338_v50 = vsel %vm288_vm0, %v318_v52, 0.0  ;;  %v438_v55 = vsel %vm409_vm1, %v435_v48, %v437_v61 }
 0x11a   : > { %v1045_v59 = vpop.eup %1044  ;;  %1056 = vrcp.f32 %v633_v28  ;;  %v941_v42 = vmul.f32 -1.442695, %v573_v29  ;;  %v390_v49 = vmul.f32 %v1491_v53, %v319_v56  ;;  %v472_v51 = vadd.f32 %v438_v55, %v354_v47 }
 0x11b   : > { %v540_v43 = vsel %vm511_vm2, %v537_v34, %v539_v63  ;;  %v391_v57 = vmul.f32 %v1491_v53, %v338_v50  ;;  %v492_v23 = vmul.f32 %v1493_v54, %v319_v56  ;;  %v356_v7 = vmul.f32 %v1495_v60, %v319_v56 }
 0x11c   : > { %700 = vperm.xlu1 %1015, %v1045_v59   ;;  %v1047_v35 = vpop.eup %1046  ;;  %1058 = vpow2.f32 %v941_v42  ;;  %v439_v10 = vrot.slane %v390_v49, 1  ;;  %v493_v17 = vmul.f32 %v1493_v54, %v338_v50  ;;  %v574_v41 = vadd.f32 %v540_v43, %v472_v51 }
 0x11d   : > { %v634_v58 = vadd.f32 1.0, %v1047_v35  ;;  %v441_v48 = vrot.slane %v391_v57, 1  ;;  %v541_v46 = vrot.slane %v492_v23, 2 }
 0x11e   : > { %v1049_v62 = vpop.eup %1048  ;;  %v440_v40 = vsel %vm409_vm1, %v437_v61, %v439_v10  ;;  %v543_v34 = vrot.slane %v493_v17, 2  ;;  %v942_v53 = vmul.f32 -1.442695, %v574_v41 }
 0x11f   : > { %v1051_v28 = vpop.eup %1050  ;;  %1060 = vrcp.f32 %v634_v58  ;;  %v442_v16 = vsel %vm409_vm1, %v439_v10, %v441_v48  ;;  %v473_v3 = vadd.f32 %v440_v40, %v355_v22  ;;  %v542_v11 = vsel %vm511_vm2, %v539_v63, %v541_v46 }
 0x120   : > { %705 = vperm.xlu1 %1015, %v1049_v62   ;;  %v635_v47 = vadd.f32 1.0, %v1051_v28  ;;  %v474_v60 = vadd.f32 %v442_v16, %v356_v7  ;;  %v544_v54 = vsel %vm511_vm2, %v541_v46, %v543_v34  ;;  %1062 = vpow2.f32 %v942_v53 }
 0x121   : > { %v575_v29 = vadd.f32 %v542_v11, %v473_v3 }
 0x122   : > { %v1053_v52 = vpop.eup %1052  ;;  %1064 = vrcp.f32 %v635_v47  ;;  %v576_v56 = vadd.f32 %v544_v54, %v474_v60 }
 0x123   : > { %v1055_v59 = vpop.eup %1054  ;;  %v636_v61 = vadd.f32 1.0, %v1053_v52  ;;  %v943_v50 = vmul.f32 -1.442695, %v575_v29 }
 0x124   : > { %710 = vperm.xlu1 %1015, %v1055_v59   ;;  %v1057_v42 = vpop.eup %1056  ;;  %v944_v55 = vmul.f32 -1.442695, %v576_v56 }
 0x125   : > { %1066 = vrcp.f32 %v636_v61 }
 0x126   : > { %1068 = vpow2.f32 %v943_v50  ;;  %v1059_v22 = vpop.eup %1058 }
 0x127   : > { %1070 = vpow2.f32 %v944_v55  ;;  %v637_v49 = vadd.f32 1.0, %v1059_v22 }
 0x128   : > { %715 = vperm.xlu1 %1015, %v1057_v42  }
 0x129   : > { %v1061_v63 = vpop.eup %1060  ;;  %1072 = vrcp.f32 %v637_v49  ;;  %v1751_v49 = vld [vmem:[#allocation12_spill] sm:$0xff] }
 0x12a   : > { %720 = vperm.xlu0 %1014, %v1061_v63   ;;  %v1063_v51 = vpop.eup %1062 }
 0x12b   : > { %v638_v57 = vadd.f32 1.0, %v1063_v51 }
 0x12c   : > { %v1065_v43 = vpop.eup %1064 }
 0x12d   : > { %725 = vperm.xlu1 %1015, %v1065_v43   ;;  %1074 = vrcp.f32 %v638_v57 }
 0x12f   : > { %v1067_v23 = vpop.eup %1066 }
 0x130   : > { %v1069_v35 = vpop.eup %1068  ;;  %730 = vperm.xlu0 %1014, %v1067_v23  }
 0x131   : > { %v1071_v7 = vpop.eup %1070  ;;  %v639_v10 = vadd.f32 1.0, %v1069_v35 }
 0x132   : > { %v640_v17 = vadd.f32 1.0, %v1071_v7 }
 0x133   : > { %1076 = vrcp.f32 %v639_v10  ;;  %v1073_v58 = vpop.eup %1072 }
 0x134   : > { %1078 = vrcp.f32 %v640_v17  ;;  %735 = vperm.xlu1 %1015, %v1073_v58  }
 0x137   : > { %v1075_v41 = vpop.eup %1074 }
 0x138   : > { %740 = vperm.xlu0 %1014, %v1075_v41  }
 0x13d   : > { %v1077_v48 = vpop.eup %1076 }
 0x13e   : > { %v1079_v46 = vpop.eup %1078  ;;  %745 = vperm.xlu1 %1015, %v1077_v48  }
 0x13f   : > { %750 = vperm.xlu0 %1014, %v1079_v46  }
 0x18a   : > { %v676_v62 = vpop.permute.xlu0 %675 }
 0x18b   : > { %v681_v40 = vpop.permute.xlu1 %680  ;;  %v753_v34 = vmul.f32 %v676_v62, %v1370_v2  ;;  %v754_v28 = vmul.f32 %v676_v62, %v1375_v4 }
 0x18c   : > { %v755_v53 = vmul.f32 %v681_v40, %v1386_v8  ;;  %v756_v16 = vmul.f32 %v681_v40, %v1389_v9 }
 0x18d   : > { %785 = vst [vmem:[%s1617_s7] sm:$0xff] %v753_v34  ;;  %786 = vst [vmem:[%s1617_s7 + $0x8] sm:$0xff] %v754_v28 }
 0x18e   : > { %787 = vst [vmem:[%s1617_s7 + $0x10] sm:$0xff] %v755_v53  ;;  %788 = vst [vmem:[%s1617_s7 + $0x18] sm:$0xff] %v756_v16 }
 0x18f   : > { %v686_v2 = vpop.permute.xlu1 %685 }
 0x190   : > { %v757_v4 = vmul.f32 %v686_v2, %v1364_v0  ;;  %v758_v8 = vmul.f32 %v686_v2, %v1367_v1 }
 0x192   : > { %789 = vst [vmem:[%s1617_s7 + $0x20] sm:$0xff] %v757_v4  ;;  %790 = vst [vmem:[%s1617_s7 + $0x28] sm:$0xff] %v758_v8 }
 0x193   : > { %v691_v9 = vpop.permute.xlu1 %690 }
 0x194   : > { %v759_v3 = vmul.f32 %v691_v9, %v1378_v5  ;;  %v760_v47 = vmul.f32 %v691_v9, %v1381_v6 }
 0x196   : > { %791 = vst [vmem:[%s1617_s7 + $0x30] sm:$0xff] %v759_v3  ;;  %792 = vst [vmem:[%s1617_s7 + $0x38] sm:$0xff] %v760_v47 }
 0x197   : > { %v696_v60 = vpop.permute.xlu1 %695 }
 0x198   : > { %v761_v11 = vmul.f32 %v696_v60, %v1402_v14  ;;  %v762_v0 = vmul.f32 %v696_v60, %v1405_v15 }
 0x19a   : > { %793 = vst [vmem:[%s1617_s7 + $0x40] sm:$0xff] %v761_v11  ;;  %794 = vst [vmem:[%s1617_s7 + $0x48] sm:$0xff] %v762_v0 }
 0x19b   : > { %v701_v1 = vpop.permute.xlu1 %700 }
 0x19c   : > { %v763_v54 = vmul.f32 %v701_v1, %v1396_v12  ;;  %v764_v5 = vmul.f32 %v701_v1, %v1399_v13 }
 0x19e   : > { %795 = vst [vmem:[%s1617_s7 + $0x50] sm:$0xff] %v763_v54  ;;  %796 = vst [vmem:[%s1617_s7 + $0x58] sm:$0xff] %v764_v5 }
 0x19f   : > { %v706_v6 = vpop.permute.xlu1 %705 }
 0x1a0   : > { %v765_v52 = vmul.f32 %v706_v6, %v1418_v20  ;;  %v766_v14 = vmul.f32 %v706_v6, %v1421_v21 }
 0x1a2   : > { %797 = vst [vmem:[%s1617_s7 + $0x60] sm:$0xff] %v765_v52  ;;  %798 = vst [vmem:[%s1617_s7 + $0x68] sm:$0xff] %v766_v14 }
 0x1a3   : > { %v711_v15 = vpop.permute.xlu1 %710 }
 0x1a4   : > { %v767_v29 = vmul.f32 %v711_v15, %v1412_v18  ;;  %v768_v12 = vmul.f32 %v711_v15, %v1415_v19 }
 0x1a6   : > { %799 = vst [vmem:[%s1617_s7 + $0x70] sm:$0xff] %v767_v29  ;;  %800 = vst [vmem:[%s1617_s7 + $0x78] sm:$0xff] %v768_v12 }
 0x1a7   : > { %v716_v13 = vpop.permute.xlu1 %715 }
 0x1a8   : > { %v769_v59 = vmul.f32 %v716_v13, %v1434_v26  ;;  %v770_v20 = vmul.f32 %v716_v13, %v1437_v27 }
 0x1a9   : > { %v721_v21 = vpop.permute.xlu0 %720 }
 0x1aa   : > { %801 = vst [vmem:[%s1617_s7 + $0x80] sm:$0xff] %v769_v59  ;;  %802 = vst [vmem:[%s1617_s7 + $0x88] sm:$0xff] %v770_v20  ;;  %v771_v61 = vmul.f32 %v721_v21, %v1428_v24  ;;  %v772_v18 = vmul.f32 %v721_v21, %v1431_v25 }
 0x1ac   : > { %803 = vst [vmem:[%s1617_s7 + $0x90] sm:$0xff] %v771_v61  ;;  %804 = vst [vmem:[%s1617_s7 + $0x98] sm:$0xff] %v772_v18  ;;  %v726_v19 = vpop.permute.xlu1 %725 }
 0x1ad   : > { %v773_v56 = vmul.f32 %v726_v19, %v1450_v32  ;;  %v774_v26 = vmul.f32 %v726_v19, %v1453_v33 }
 0x1af   : > { %v731_v27 = vpop.permute.xlu0 %730  ;;  %805 = vst [vmem:[%s1617_s7 + $0xa0] sm:$0xff] %v773_v56  ;;  %806 = vst [vmem:[%s1617_s7 + $0xa8] sm:$0xff] %v774_v26 }
 0x1b0   : > { %v775_v50 = vmul.f32 %v731_v27, %v1444_v30  ;;  %v776_v42 = vmul.f32 %v731_v27, %v1447_v31 }
 0x1b2   : > { %807 = vst [vmem:[%s1617_s7 + $0xb0] sm:$0xff] %v775_v50  ;;  %808 = vst [vmem:[%s1617_s7 + $0xb8] sm:$0xff] %v776_v42 }
 0x1b3   : > { %v736_v24 = vpop.permute.xlu1 %735 }
 0x1b4   : > { %v777_v25 = vmul.f32 %v736_v24, %v1466_v38  ;;  %v778_v32 = vmul.f32 %v736_v24, %v1469_v39 }
 0x1b6   : > { %809 = vst [vmem:[%s1617_s7 + $0xc0] sm:$0xff] %v777_v25  ;;  %810 = vst [vmem:[%s1617_s7 + $0xc8] sm:$0xff] %v778_v32 }
 0x1b7   : > { %v741_v33 = vpop.permute.xlu0 %740 }
 0x1b8   : > { %v779_v30 = vmul.f32 %v741_v33, %v1460_v36  ;;  %v780_v31 = vmul.f32 %v741_v33, %v1463_v37  ;;  %v1750_v36 = vld [vmem:[#allocation11_spill] sm:$0xff] }
 0x1ba   : > { %811 = vst [vmem:[%s1617_s7 + $0xd0] sm:$0xff] %v779_v30  ;;  %812 = vst [vmem:[%s1617_s7 + $0xd8] sm:$0xff] %v780_v31 }
 0x1bd   : > { %v746_v38 = vpop.permute.xlu1 %745 }
 0x1be   : > { %v751_v55 = vpop.permute.xlu0 %750  ;;  %v781_v39 = vmul.f32 %v746_v38, %v1482_v44  ;;  %v782_v22 = vmul.f32 %v746_v38, %v1485_v45 }
 0x1bf   : > { %v783_v37 = vmul.f32 %v751_v55, %v1750_v36  ;;  %v784_v63 = vmul.f32 %v751_v55, %v1751_v49 }
 0x1c0   : > { %813 = vst [vmem:[%s1617_s7 + $0xe0] sm:$0xff] %v781_v39  ;;  %814 = vst [vmem:[%s1617_s7 + $0xe8] sm:$0xff] %v782_v22 }
 0x1c1   : > { %815 = vst [vmem:[%s1617_s7 + $0xf0] sm:$0xff] %v783_v37  ;;  %816 = vst [vmem:[%s1617_s7 + $0xf8] sm:$0xff] %v784_v63 }
 0x1c2   : > { %1138 = shalt.err (!%p1135_p11)
}
 0x1c3   : > { %s1139_s6 = scalar_lea.hbm %s1678_s30, 4096  ;;  %s1143_s24 = scalar_lea.hbm %s1732_s2, 8192 }
 0x1c4   : > { %p1140_p0 = scmp.ne.s32.totalorder %s1678_s30, %s1139_s6  ;;  %p1144_p6 = scmp.lt.u32.totalorder %s1678_s30, %s1732_s2 }
 0x1c5   : > { %p1145_p3 = scmp.lt.u32.totalorder %s1143_s24, %s1139_s6  ;;  %p1147_p5 = scmp.lt.u32.totalorder %s1139_s6, %s1678_s30 }
 0x1c6   : > { %p1141_p2 = pnand %p1140_p0, %p1752_p12 }
 0x1c7   : > { %p1146_p13 = por %p1145_p3, %p1144_p6 }
 0x1c8   : > { %p1142_p7 = pneg %p1141_p2 }
 0x1c9   : > { %p1148_p8 = por %p1147_p5, %p1146_p13 }
 0x1cb   : > { %p1149_p9 = pnand %p1148_p8, %p1142_p7 }
 0x1cd   : > { %1152 = shalt.err (!%p1149_p9)
}
 0x1ce   : > { %s1203_s23 = smov 256   ;;  %s1204_s29 = smov 16  }
 0x1cf   : > { %958 = dma.vmem_to_hbm [thread:$0]  (%p1752_p12), %s1680_s17, 4096, %s1678_s30, %s818_s13, %s1203_s23, %s1203_s23, %s1204_s29  }
 0x1d0 PF: > { %s846_s7 = sand.u32 1, %s1183_s9   ;;  %p1753_p10 = scmp.ne.s32.totalorder %s1741_s22, 0 }
 0x1d1   : > { %p1754_p1 = scmp.ge.s32.totalorder %s1195_s12, 2  ;;  %s847_s16 = scalar_lea.sflag [#allocation4], %s846_s7 }
 0x1d3   : > { %p969_p4 = pnand %p1754_p1, %p1753_p10 }
 0x1d5   : > { %1178 = dma.done.wait (!%p969_p4), %s847_s16, 4096  }
 0x1d6   : > { %1180 = vsyncadd (!%p969_p4), %s847_s16, 4294963200  ;;  %p16_p11 = scmp.ge.s32.totalorder %s1245_s15, 4   ;;  %s1755_s9 = smov %s1187_s10 }
 0x1d7   : > { %s1756_s10 = smov %s1191_s11  ;;  %s1757_s11 = smov %s1257_s18 }
 0x1d8   : > { %s1758_s12 = smov %s1245_s15  ;;  %18 = sbr.rel (!%p16_p11) target bundleno = 6 (0x6), region = 78 }
 0x1df   :  { %852 = vsyncpa [#allocation3], 1 }
 0x1e0   :  { %854 = vsyncpa [#allocation3 + $0x1], 1 }
 0x1e1   :  { %855 = vsyncpa [#allocation4], 1 }
 0x1e2   :  { %857 = vsyncpa [#allocation4 + $0x1], 1 }
 0x1e3   :  { %858 = vsyncpa [#allocation5], 1 }
 0x1e4   :  { %860 = vsyncpa [#allocation5 + $0x1], 1 }

</bundles_post_ra>
